<compile_context>
chip_gen: v5e
topology: v5e:2x2
jax: 0.10.0
libtpu: 0.0.40
codegen_flags: <defaults>
</compile_context>

<pallas_src>
import functools
import math

import jax
import jax.numpy as jnp
from jax import lax
from jax.experimental import pallas as pl
from jax.experimental.pallas import tpu as pltpu

# len(WATERSHED_ENERGY_BINS) == 16  ->  num_classes == 17 (matches cs_scaling)
NUM_CLASSES = 17
EPSILON = 1e-25
LOG_EPSILON = math.log(EPSILON)
CS_SCALING = jnp.array([3.0, 3.0, 3.0, 2.0] + [1.0] * 13, dtype=jnp.float32)


def _wel_kernel(logits_ref, wngy_ref, area_ref,          # VMEM (1,C,T)/(1,1,T)
                out_ref,                                  # VMEM (1,1,8,128) per-(image,half) partials
                loss_nz_acc, loss_z_acc, w_nz_acc,        # VMEM (1,T) scratch
                cnt_z_acc, amax_acc,                      # VMEM (1,T) scratch
                *, hw, tile, nh, num_j, needs_mask, first_masked_gb):
    j = pl.program_id(2)
    gb = pl.program_id(1) * nh + j            # global (unclamped) pixel-block index

    @pl.when(j == 0)
    def _():
        loss_nz_acc[...] = jnp.zeros_like(loss_nz_acc)
        loss_z_acc[...] = jnp.zeros_like(loss_z_acc)
        w_nz_acc[...] = jnp.zeros_like(w_nz_acc)
        cnt_z_acc[...] = jnp.zeros_like(cnt_z_acc)
        amax_acc[...] = jnp.zeros_like(amax_acc)

    # ---- class-split log-softmax: (16,T) slab + (1,T) strip, classes on sublanes
    xa = logits_ref[0, 0:16, :].astype(jnp.float32)      # (16, T)
    xb = logits_ref[0, 16:17, :].astype(jnp.float32)     # (1, T)
    labels = wngy_ref[0]                                 # (1, T) int32
    area = area_ref[0].astype(jnp.float32)               # (1, T)

    m = jnp.maximum(jnp.max(xa, axis=0, keepdims=True), xb)         # (1, T)
    xma = xa - m                                                     # bound once
    xmb = xb - m
    ea = jnp.exp(xma)
    eb = jnp.exp(xmb)
    s = jnp.sum(ea, axis=0, keepdims=True) + eb                      # (1, T)
    log_s = jnp.log(s)

    # log(max(p, eps)) == max(log p, log eps)
    log_pa = jnp.maximum(xma - log_s, LOG_EPSILON)                   # (16, T)
    log_pb = jnp.maximum(xmb - log_s, LOG_EPSILON)                   # (1, T)
    # log(max(1 - p, eps)) == log(max(s - e, eps*s)) - log s
    log_1mpa = jnp.log(jnp.maximum(s - ea, EPSILON * s)) - log_s     # (16, T)
    log_1mpb = jnp.log(jnp.maximum(s - eb, EPSILON * s)) - log_s     # (1, T)

    cls = lax.broadcasted_iota(jnp.int32, xa.shape, 0)
    lla = jnp.where(cls == labels, log_pa, log_1mpa)                 # (16, T)
    llb = jnp.where(labels == (NUM_CLASSES - 1), log_pb, log_1mpb)   # (1, T)

    # class scaling [3,3,3,2,1*13]; class 16 scale is 1.0 -> llb enters unscaled
    cidx = lax.broadcasted_iota(jnp.int32, (16, 1), 0)
    csa = jnp.where(cidx < 3, 3.0,
                    jnp.where(cidx == 3, 2.0, 1.0)).astype(jnp.float32)
    # TODO(synk): try MXU offload (jnp.dot(csa.T, lla)) if dumps show VALU/XLU binding.
    csum = jnp.sum(lla * csa, axis=0, keepdims=True) + llb           # (1, T)

    # area == 0 pixels use rsqrt(global area max); weight enters linearly, so
    # split accumulation and apply rsqrt(amax) in the JAX combine.
    area0 = area == 0.0
    w_nz = jnp.where(area0, 0.0, lax.rsqrt(area))                    # (1, T)
    loss_nz_t = csum * w_nz
    loss_z_t = jnp.where(area0, csum, 0.0)
    cnt_z_t = jnp.where(area0, 1.0, 0.0)

    def accumulate(valid):
        if valid is None:
            loss_nz_acc[...] += loss_nz_t
            loss_z_acc[...] += loss_z_t
            w_nz_acc[...] += w_nz
            cnt_z_acc[...] += cnt_z_t
            amax_acc[...] = jnp.maximum(amax_acc[...], area)
        else:
            # select-based masking: overhang lanes may hold NaN/inf garbage
            loss_nz_acc[...] += jnp.where(valid, loss_nz_t, 0.0)
            loss_z_acc[...] += jnp.where(valid, loss_z_t, 0.0)
            w_nz_acc[...] += jnp.where(valid, w_nz, 0.0)
            cnt_z_acc[...] += jnp.where(valid, cnt_z_t, 0.0)
            amax_acc[...] = jnp.maximum(amax_acc[...],
                                        jnp.where(valid, area, 0.0))

    if needs_mask:
        # Only the blocks that overhang hw (or are fully past it) pay for the mask.
        @pl.when(gb >= first_masked_gb)
        def _():
            pix = gb * tile + lax.broadcasted_iota(jnp.int32, (1, tile), 1)
            accumulate(pix < hw)

        @pl.when(gb < first_masked_gb)
        def _():
            accumulate(None)
    else:
        accumulate(None)

    @pl.when(j == pl.num_programs(2) - 1)
    def _():
        row = lax.broadcasted_iota(jnp.int32, out_ref.shape, 2)
        out_ref[...] = jnp.where(
            row == 0, jnp.sum(loss_nz_acc[...]),
            jnp.where(row == 1, jnp.sum(loss_z_acc[...]),
            jnp.where(row == 2, jnp.sum(w_nz_acc[...]),
            jnp.where(row == 3, jnp.sum(cnt_z_acc[...]),
                      jnp.max(amax_acc[...])))))


def watershed_energy_loss(logits, wngy, semg, area, *, tile_px=32768):
    """logits (N,17,H,W) f32/bf16, wngy (N,1,H,W) int, semg (N,1,H,W), area (N,1,H,W)."""
    del semg  # cast to bool in the torch module but never used in forward
    n, c, h, w = logits.shape
    assert c == NUM_CLASSES
    hw = h * w

    # Native NCHW layout, just collapse H and W (free reshape, no HBM pass):
    # classes end up on sublanes, pixels lane-dense inside the kernel.
    logits3 = logits.reshape(n, c, hw)
    wngy3 = wngy.reshape(n, 1, hw).astype(jnp.int32)
    area3 = area.reshape(n, 1, hw).astype(jnp.float32)

    # choose a lane-dense pixel tile (multiple of 128, <= padded HW)
    hw_pad = ((hw + 127) // 128) * 128
    tile = max(128, min(tile_px, hw_pad))
    tile = (tile // 128) * 128
    num_j = -(-hw // tile)                      # total pixel blocks
    nh = -(-num_j // 2)                         # blocks per half (2-way split for v7x TCs)
    needs_mask = (2 * nh * tile) != hw
    first_masked_gb = (num_j - 1) if (hw % tile != 0) else num_j

    kernel = functools.partial(_wel_kernel, hw=hw, tile=tile, nh=nh,
                               num_j=num_j, needs_mask=needs_mask,
                               first_masked_gb=first_masked_gb)

    def px_map(i, p, j):
        # clamp so fully out-of-range blocks re-read the last real block
        # (their contributions are masked out in-kernel)
        return (i, 0, jnp.minimum(p * nh + j, num_j - 1))

    # TODO(synk): consider pipeline_mode=pl.Buffered(3) on the logits spec if a
    # v5e trace shows exposed DMA at step boundaries.
    out = pl.pallas_call(
        kernel,
        out_shape=jax.ShapeDtypeStruct((n, 2, 8, 128), jnp.float32),
        grid_spec=pltpu.PrefetchScalarGridSpec(
            num_scalar_prefetch=0,
            grid=(n, 2, nh),
            in_specs=[
                pl.BlockSpec((1, c, tile), px_map),        # logits
                pl.BlockSpec((1, 1, tile), px_map),        # wngy
                pl.BlockSpec((1, 1, tile), px_map),        # area
            ],
            out_specs=pl.BlockSpec((1, 1, 8, 128), lambda i, p, j: (i, p, 0, 0)),
            scratch_shapes=[pltpu.VMEM((1, tile), jnp.float32)] * 5,
        ),
        compiler_params=pltpu.CompilerParams(
            dimension_semantics=("parallel", "parallel", "arbitrary"),
            vmem_limit_bytes=48 * 1024 * 1024),
    )(logits3, wngy3, area3)

    # tiny JAX combine over (N, 2) partials
    l_nz = jnp.sum(out[:, :, 0, 0])       # sum_c(ll*cs)*rsqrt(area) over area!=0 pixels
    l_z = jnp.sum(out[:, :, 1, 0])        # sum_c(ll*cs) over area==0 pixels
    w_s = jnp.sum(out[:, :, 2, 0])        # sum of rsqrt(area) over area!=0 pixels
    c_z = jnp.sum(out[:, :, 3, 0])        # count of area==0 pixels
    a_m = jnp.max(out[:, :, 4, 0])        # global area max
    w0 = lax.rsqrt(a_m)                   # all-zero-area edge case -> inf (matches ref)
    loss_num = -(l_nz + w0 * l_z)
    w_sum = w_s + w0 * c_z
    return loss_num / (w_sum + 1.0)


def watershed_energy_loss_ref(logits, wngy, semg, area):
    """Pure-JAX reference mirroring the torch forward."""
    del semg
    n, c, h, w = logits.shape
    lg = jnp.transpose(logits, (0, 2, 3, 1)).reshape(-1, c).astype(jnp.float32)
    wn = jnp.transpose(wngy, (0, 2, 3, 1)).reshape(-1)
    ar = jnp.transpose(area, (0, 2, 3, 1)).reshape(-1, 1).astype(jnp.float32)
    ar = jnp.where(ar == 0.0, jnp.max(ar), ar)
    weight = 1.0 / jnp.sqrt(ar)
    p = jax.nn.softmax(lg, axis=1)
    gt = jax.nn.one_hot(wn, c, dtype=jnp.float32)
    ll = gt * jnp.log(jnp.maximum(p, EPSILON)) \
        + (1.0 - gt) * jnp.log(jnp.maximum(1.0 - p, EPSILON))
    cs = -(ll * weight * CS_SCALING).sum()
    return cs / (weight.sum() + 1.0)


def _make_inputs(key, n, h, w):
    k1, k2, k3, k4, k5 = jax.random.split(key, 5)
    logits = jax.random.normal(k1, (n, NUM_CLASSES, h, w), dtype=jnp.float32)
    wngy = jax.random.randint(k2, (n, 1, h, w), 0, NUM_CLASSES, dtype=jnp.int32)
    semg = (jax.random.uniform(k3, (n, 1, h, w)) > 0.5).astype(jnp.float32)
    area = jax.random.uniform(k4, (n, 1, h, w), minval=1.0, maxval=100.0)
    # sprinkle some zeros to exercise the area==0 -> area.max() path
    area = area * (jax.random.uniform(k5, (n, 1, h, w)) > 0.15).astype(jnp.float32)
    return logits, wngy, semg, area


if __name__ == "__main__":
    key = jax.random.PRNGKey(0)
    k_a, k_b = jax.random.split(key)

    # Case 1: default tile (single block per half, one half fully masked out).
    logits, wngy, semg, area = _make_inputs(k_a, n=2, h=16, w=16)
    out = watershed_energy_loss(logits, wngy, semg, area)
    out = jax.block_until_ready(out)
    ref = watershed_energy_loss_ref(logits, wngy, semg, area)
    assert jnp.isfinite(out), "non-finite loss (case 1)"
    assert jnp.allclose(out, ref, rtol=1e-3, atol=1e-3), (out, ref)

    # Case 2: small tile to exercise multi-step accumulation + ragged last block.
    logits2, wngy2, semg2, area2 = _make_inputs(k_b, n=1, h=24, w=20)
    out2 = watershed_energy_loss(logits2, wngy2, semg2, area2, tile_px=128)
    out2 = jax.block_until_ready(out2)
    ref2 = watershed_energy_loss_ref(logits2, wngy2, semg2, area2)
    assert jnp.isfinite(out2), "non-finite loss (case 2)"
    assert jnp.allclose(out2, ref2, rtol=1e-3, atol=1e-3), (out2, ref2)

    print("KERNEL_OK")
</pallas_src>

<mosaic_0001>
module attributes {stable_mosaic.version = 11 : i64} {
  func.func @_wel_kernel(%arg0: i32, %arg1: i32, %arg2: i32, %arg3: memref<1x17x256xf32, #tpu.memory_space<vmem>>, %arg4: memref<1x1x256xi32, #tpu.memory_space<vmem>>, %arg5: memref<1x1x256xf32, #tpu.memory_space<vmem>>, %arg6: memref<1x1x8x128xf32, #tpu.memory_space<vmem>>, %arg7: memref<1x256xf32, #tpu.memory_space<vmem>>, %arg8: memref<1x256xf32, #tpu.memory_space<vmem>>, %arg9: memref<1x256xf32, #tpu.memory_space<vmem>>, %arg10: memref<1x256xf32, #tpu.memory_space<vmem>>, %arg11: memref<1x256xf32, #tpu.memory_space<vmem>>) attributes {dimension_semantics = [#tpu.dimension_semantics<parallel>, #tpu.dimension_semantics<parallel>, #tpu.dimension_semantics<arbitrary>], iteration_bounds = array<i64: 2, 2, 1>, scalar_prefetch = 0 : i64, scratch_operands = 5 : i64, tpu.core_type = #tpu.core_type<tc>, window_params = [{transform_indices = @transform_0, window_bounds = array<i64: 1, 17, 256>}, {transform_indices = @transform_1, window_bounds = array<i64: 1, 1, 256>}, {transform_indices = @transform_2, window_bounds = array<i64: 1, 1, 256>}, {transform_indices = @transform_3, window_bounds = array<i64: 1, 1, 8, 128>}]} {
    %c1_i32 = arith.constant 1 : i32
    %0 = arith.muli %arg1, %c1_i32 : i32
    %1 = arith.addi %0, %arg2 : i32
    %c0_i32 = arith.constant 0 : i32
    %2 = arith.cmpi eq, %arg2, %c0_i32 : i32
    %3 = arith.extui %2 : i1 to i32
    %c0_i32_0 = arith.constant 0 : i32
    %4 = arith.cmpi ne, %3, %c0_i32_0 : i32
    scf.if %4 {
      %cst_32 = arith.constant 0.000000e+00 : f32
      %89 = vector.broadcast %cst_32 : f32 to vector<1x256xf32>
      %c0_33 = arith.constant 0 : index
      %c0_34 = arith.constant 0 : index
      %90 = vector.load %arg7[%c0_33, %c0_34] : memref<1x256xf32, #tpu.memory_space<vmem>>, vector<1x256xf32>
      tpu.vector_store %arg7[%c0_33, %c0_34], %89 {strides = array<i32>} : memref<1x256xf32, #tpu.memory_space<vmem>>, vector<1x256xf32>,
      %cst_35 = arith.constant 0.000000e+00 : f32
      %91 = vector.broadcast %cst_35 : f32 to vector<1x256xf32>
      %c0_36 = arith.constant 0 : index
      %c0_37 = arith.constant 0 : index
      %92 = vector.load %arg8[%c0_36, %c0_37] : memref<1x256xf32, #tpu.memory_space<vmem>>, vector<1x256xf32>
      tpu.vector_store %arg8[%c0_36, %c0_37], %91 {strides = array<i32>} : memref<1x256xf32, #tpu.memory_space<vmem>>, vector<1x256xf32>,
      %cst_38 = arith.constant 0.000000e+00 : f32
      %93 = vector.broadcast %cst_38 : f32 to vector<1x256xf32>
      %c0_39 = arith.constant 0 : index
      %c0_40 = arith.constant 0 : index
      %94 = vector.load %arg9[%c0_39, %c0_40] : memref<1x256xf32, #tpu.memory_space<vmem>>, vector<1x256xf32>
      tpu.vector_store %arg9[%c0_39, %c0_40], %93 {strides = array<i32>} : memref<1x256xf32, #tpu.memory_space<vmem>>, vector<1x256xf32>,
      %cst_41 = arith.constant 0.000000e+00 : f32
      %95 = vector.broadcast %cst_41 : f32 to vector<1x256xf32>
      %c0_42 = arith.constant 0 : index
      %c0_43 = arith.constant 0 : index
      %96 = vector.load %arg10[%c0_42, %c0_43] : memref<1x256xf32, #tpu.memory_space<vmem>>, vector<1x256xf32>
      tpu.vector_store %arg10[%c0_42, %c0_43], %95 {strides = array<i32>} : memref<1x256xf32, #tpu.memory_space<vmem>>, vector<1x256xf32>,
      %cst_44 = arith.constant 0.000000e+00 : f32
      %97 = vector.broadcast %cst_44 : f32 to vector<1x256xf32>
      %c0_45 = arith.constant 0 : index
      %c0_46 = arith.constant 0 : index
      %98 = vector.load %arg11[%c0_45, %c0_46] : memref<1x256xf32, #tpu.memory_space<vmem>>, vector<1x256xf32>
      tpu.vector_store %arg11[%c0_45, %c0_46], %97 {strides = array<i32>} : memref<1x256xf32, #tpu.memory_space<vmem>>, vector<1x256xf32>,
    } else {
    }
    %c0 = arith.constant 0 : index
    %c0_1 = arith.constant 0 : index
    %c0_2 = arith.constant 0 : index
    %5 = vector.load %arg3[%c0, %c0_1, %c0_2] : memref<1x17x256xf32, #tpu.memory_space<vmem>>, vector<1x16x256xf32>
    %6 = vector.shape_cast %5 : vector<1x16x256xf32> to vector<16x256xf32>
    %c0_3 = arith.constant 0 : index
    %c16 = arith.constant 16 : index
    %c0_4 = arith.constant 0 : index
    %7 = vector.load %arg3[%c0_3, %c16, %c0_4] : memref<1x17x256xf32, #tpu.memory_space<vmem>>, vector<1x1x256xf32>
    %8 = vector.shape_cast %7 : vector<1x1x256xf32> to vector<1x256xf32>
    %c0_5 = arith.constant 0 : index
    %c0_6 = arith.constant 0 : index
    %c0_7 = arith.constant 0 : index
    %9 = vector.load %arg4[%c0_5, %c0_6, %c0_7] : memref<1x1x256xi32, #tpu.memory_space<vmem>>, vector<1x1x256xi32>
    %10 = vector.shape_cast %9 : vector<1x1x256xi32> to vector<1x256xi32>
    %c0_8 = arith.constant 0 : index
    %c0_9 = arith.constant 0 : index
    %c0_10 = arith.constant 0 : index
    %11 = vector.load %arg5[%c0_8, %c0_9, %c0_10] : memref<1x1x256xf32, #tpu.memory_space<vmem>>, vector<1x1x256xf32>
    %12 = vector.shape_cast %11 : vector<1x1x256xf32> to vector<1x256xf32>
    %cst = arith.constant dense<0xFF800000> : vector<256xf32>
    %13 = vector.multi_reduction <maximumf>, %6, %cst [0] : vector<16x256xf32> to vector<256xf32>
    %14 = vector.shape_cast %13 : vector<256xf32> to vector<1x256xf32>
    %15 = arith.maximumf %14, %8 : vector<1x256xf32>
    %16 = vector.broadcast %15 : vector<1x256xf32> to vector<16x256xf32>
    %17 = arith.subf %6, %16 : vector<16x256xf32>
    %18 = arith.subf %8, %15 : vector<1x256xf32>
    %19 = math.exp %17 : vector<16x256xf32>
    %20 = math.exp %18 : vector<1x256xf32>
    %cst_11 = arith.constant dense<0.000000e+00> : vector<256xf32>
    %21 = vector.multi_reduction <add>, %19, %cst_11 [0] : vector<16x256xf32> to vector<256xf32>
    %22 = vector.shape_cast %21 : vector<256xf32> to vector<1x256xf32>
    %23 = arith.addf %22, %20 : vector<1x256xf32>
    %24 = math.log %23 : vector<1x256xf32>
    %25 = vector.broadcast %24 : vector<1x256xf32> to vector<16x256xf32>
    %26 = arith.subf %17, %25 : vector<16x256xf32>
    %cst_12 = arith.constant -57.5646286 : f32
    %27 = vector.broadcast %cst_12 : f32 to vector<16x256xf32>
    %28 = arith.maximumf %26, %27 : vector<16x256xf32>
    %29 = arith.subf %18, %24 : vector<1x256xf32>
    %cst_13 = arith.constant -57.5646286 : f32
    %30 = vector.broadcast %cst_13 : f32 to vector<1x256xf32>
    %31 = arith.maximumf %29, %30 : vector<1x256xf32>
    %32 = vector.broadcast %23 : vector<1x256xf32> to vector<16x256xf32>
    %33 = arith.subf %32, %19 : vector<16x256xf32>
    %cst_14 = arith.constant 1.000000e-25 : f32
    %34 = vector.broadcast %cst_14 : f32 to vector<1x256xf32>
    %35 = arith.mulf %34, %23 : vector<1x256xf32>
    %36 = vector.broadcast %35 : vector<1x256xf32> to vector<16x256xf32>
    %37 = arith.maximumf %33, %36 : vector<16x256xf32>
    %38 = math.log %37 : vector<16x256xf32>
    %39 = vector.broadcast %24 : vector<1x256xf32> to vector<16x256xf32>
    %40 = arith.subf %38, %39 : vector<16x256xf32>
    %41 = arith.subf %23, %20 : vector<1x256xf32>
    %cst_15 = arith.constant 1.000000e-25 : f32
    %42 = vector.broadcast %cst_15 : f32 to vector<1x256xf32>
    %43 = arith.mulf %42, %23 : vector<1x256xf32>
    %44 = arith.maximumf %41, %43 : vector<1x256xf32>
    %45 = math.log %44 : vector<1x256xf32>
    %46 = arith.subf %45, %24 : vector<1x256xf32>
    %47 = tpu.iota {dimensions = array<i32: 0>} : vector<16x256xi32>
    %48 = vector.broadcast %10 : vector<1x256xi32> to vector<16x256xi32>
    %49 = arith.cmpi eq, %47, %48 : vector<16x256xi32>
    %50 = arith.select %49, %28, %40 : vector<16x256xi1>, vector<16x256xf32>
    %c16_i32 = arith.constant 16 : i32
    %51 = vector.broadcast %c16_i32 : i32 to vector<1x256xi32>
    %52 = arith.cmpi eq, %10, %51 : vector<1x256xi32>
    %53 = arith.select %52, %31, %46 : vector<1x256xi1>, vector<1x256xf32>
    %54 = tpu.iota {dimensions = array<i32: 0>} : vector<16x1xi32>
    %c3_i32 = arith.constant 3 : i32
    %55 = vector.broadcast %c3_i32 : i32 to vector<16x1xi32>
    %56 = arith.cmpi slt, %54, %55 : vector<16x1xi32>
    %c3_i32_16 = arith.constant 3 : i32
    %57 = vector.broadcast %c3_i32_16 : i32 to vector<16x1xi32>
    %58 = arith.cmpi eq, %54, %57 : vector<16x1xi32>
    %cst_17 = arith.constant 2.000000e+00 : f32
    %cst_18 = arith.constant 1.000000e+00 : f32
    %59 = vector.broadcast %cst_17 : f32 to vector<16x1xf32>
    %60 = vector.broadcast %cst_18 : f32 to vector<16x1xf32>
    %61 = arith.select %58, %59, %60 : vector<16x1xi1>, vector<16x1xf32>
    %cst_19 = arith.constant 3.000000e+00 : f32
    %62 = vector.broadcast %cst_19 : f32 to vector<16x1xf32>
    %63 = arith.select %56, %62, %61 : vector<16x1xi1>, vector<16x1xf32>
    %64 = vector.broadcast %63 : vector<16x1xf32> to vector<16x256xf32>
    %65 = arith.mulf %50, %64 : vector<16x256xf32>
    %cst_20 = arith.constant dense<0.000000e+00> : vector<256xf32>
    %66 = vector.multi_reduction <add>, %65, %cst_20 [0] : vector<16x256xf32> to vector<256xf32>
    %67 = vector.shape_cast %66 : vector<256xf32> to vector<1x256xf32>
    %68 = arith.addf %67, %53 : vector<1x256xf32>
    %cst_21 = arith.constant 0.000000e+00 : f32
    %69 = vector.broadcast %cst_21 : f32 to vector<1x256xf32>
    %70 = arith.cmpf oeq, %12, %69 : vector<1x256xf32>
    %71 = math.rsqrt %12 : vector<1x256xf32>
    %cst_22 = arith.constant 0.000000e+00 : f32
    %72 = vector.broadcast %cst_22 : f32 to vector<1x256xf32>
    %73 = arith.select %70, %72, %71 : vector<1x256xi1>, vector<1x256xf32>
    %74 = arith.mulf %68, %73 : vector<1x256xf32>
    %cst_23 = arith.constant 0.000000e+00 : f32
    %75 = vector.broadcast %cst_23 : f32 to vector<1x256xf32>
    %76 = arith.select %70, %68, %75 : vector<1x256xi1>, vector<1x256xf32>
    %cst_24 = arith.constant 1.000000e+00 : f32
    %cst_25 = arith.constant 0.000000e+00 : f32
    %77 = vector.broadcast %cst_24 : f32 to vector<1x256xf32>
    %78 = vector.broadcast %cst_25 : f32 to vector<1x256xf32>
    %79 = arith.select %70, %77, %78 : vector<1x256xi1>, vector<1x256xf32>
    %c1_i32_26 = arith.constant 1 : i32
    %80 = arith.cmpi sge, %1, %c1_i32_26 : i32
    %81 = arith.extui %80 : i1 to i32
    %c0_i32_27 = arith.constant 0 : i32
    %82 = arith.cmpi ne, %81, %c0_i32_27 : i32
    scf.if %82 {
      %c256_i32 = arith.constant 256 : i32
      %89 = arith.muli %1, %c256_i32 : i32
      %90 = tpu.iota {dimensions = array<i32: 1>} : vector<1x256xi32>
      %91 = vector.broadcast %89 : i32 to vector<1x256xi32>
      %92 = arith.addi %91, %90 : vector<1x256xi32>
      %c256_i32_32 = arith.constant 256 : i32
      %93 = vector.broadcast %c256_i32_32 : i32 to vector<1x256xi32>
      %94 = arith.cmpi slt, %92, %93 : vector<1x256xi32>
      %c0_33 = arith.constant 0 : index
      %c0_34 = arith.constant 0 : index
      %95 = vector.load %arg7[%c0_33, %c0_34] : memref<1x256xf32, #tpu.memory_space<vmem>>, vector<1x256xf32>
      %cst_35 = arith.constant 0.000000e+00 : f32
      %96 = vector.broadcast %cst_35 : f32 to vector<1x256xf32>
      %97 = arith.select %94, %74, %96 : vector<1x256xi1>, vector<1x256xf32>
      %98 = arith.addf %95, %97 : vector<1x256xf32>
      %c0_36 = arith.constant 0 : index
      %c0_37 = arith.constant 0 : index
      %99 = vector.load %arg7[%c0_36, %c0_37] : memref<1x256xf32, #tpu.memory_space<vmem>>, vector<1x256xf32>
      tpu.vector_store %arg7[%c0_36, %c0_37], %98 {strides = array<i32>} : memref<1x256xf32, #tpu.memory_space<vmem>>, vector<1x256xf32>,
      %c0_38 = arith.constant 0 : index
      %c0_39 = arith.constant 0 : index
      %100 = vector.load %arg8[%c0_38, %c0_39] : memref<1x256xf32, #tpu.memory_space<vmem>>, vector<1x256xf32>
      %cst_40 = arith.constant 0.000000e+00 : f32
      %101 = vector.broadcast %cst_40 : f32 to vector<1x256xf32>
      %102 = arith.select %94, %76, %101 : vector<1x256xi1>, vector<1x256xf32>
      %103 = arith.addf %100, %102 : vector<1x256xf32>
      %c0_41 = arith.constant 0 : index
      %c0_42 = arith.constant 0 : index
      %104 = vector.load %arg8[%c0_41, %c0_42] : memref<1x256xf32, #tpu.memory_space<vmem>>, vector<1x256xf32>
      tpu.vector_store %arg8[%c0_41, %c0_42], %103 {strides = array<i32>} : memref<1x256xf32, #tpu.memory_space<vmem>>, vector<1x256xf32>,
      %c0_43 = arith.constant 0 : index
      %c0_44 = arith.constant 0 : index
      %105 = vector.load %arg9[%c0_43, %c0_44] : memref<1x256xf32, #tpu.memory_space<vmem>>, vector<1x256xf32>
      %cst_45 = arith.constant 0.000000e+00 : f32
      %106 = vector.broadcast %cst_45 : f32 to vector<1x256xf32>
      %107 = arith.select %94, %73, %106 : vector<1x256xi1>, vector<1x256xf32>
      %108 = arith.addf %105, %107 : vector<1x256xf32>
      %c0_46 = arith.constant 0 : index
      %c0_47 = arith.constant 0 : index
      %109 = vector.load %arg9[%c0_46, %c0_47] : memref<1x256xf32, #tpu.memory_space<vmem>>, vector<1x256xf32>
      tpu.vector_store %arg9[%c0_46, %c0_47], %108 {strides = array<i32>} : memref<1x256xf32, #tpu.memory_space<vmem>>, vector<1x256xf32>,
      %c0_48 = arith.constant 0 : index
      %c0_49 = arith.constant 0 : index
      %110 = vector.load %arg10[%c0_48, %c0_49] : memref<1x256xf32, #tpu.memory_space<vmem>>, vector<1x256xf32>
      %cst_50 = arith.constant 0.000000e+00 : f32
      %111 = vector.broadcast %cst_50 : f32 to vector<1x256xf32>
      %112 = arith.select %94, %79, %111 : vector<1x256xi1>, vector<1x256xf32>
      %113 = arith.addf %110, %112 : vector<1x256xf32>
      %c0_51 = arith.constant 0 : index
      %c0_52 = arith.constant 0 : index
      %114 = vector.load %arg10[%c0_51, %c0_52] : memref<1x256xf32, #tpu.memory_space<vmem>>, vector<1x256xf32>
      tpu.vector_store %arg10[%c0_51, %c0_52], %113 {strides = array<i32>} : memref<1x256xf32, #tpu.memory_space<vmem>>, vector<1x256xf32>,
      %c0_53 = arith.constant 0 : index
      %c0_54 = arith.constant 0 : index
      %115 = vector.load %arg11[%c0_53, %c0_54] : memref<1x256xf32, #tpu.memory_space<vmem>>, vector<1x256xf32>
      %cst_55 = arith.constant 0.000000e+00 : f32
      %116 = vector.broadcast %cst_55 : f32 to vector<1x256xf32>
      %117 = arith.select %94, %12, %116 : vector<1x256xi1>, vector<1x256xf32>
      %118 = arith.maximumf %115, %117 : vector<1x256xf32>
      %c0_56 = arith.constant 0 : index
      %c0_57 = arith.constant 0 : index
      %119 = vector.load %arg11[%c0_56, %c0_57] : memref<1x256xf32, #tpu.memory_space<vmem>>, vector<1x256xf32>
      tpu.vector_store %arg11[%c0_56, %c0_57], %118 {strides = array<i32>} : memref<1x256xf32, #tpu.memory_space<vmem>>, vector<1x256xf32>,
    } else {
    }
    %c1_i32_28 = arith.constant 1 : i32
    %83 = arith.cmpi slt, %1, %c1_i32_28 : i32
    %84 = arith.extui %83 : i1 to i32
    %c0_i32_29 = arith.constant 0 : i32
    %85 = arith.cmpi ne, %84, %c0_i32_29 : i32
    scf.if %85 {
      %c0_32 = arith.constant 0 : index
      %c0_33 = arith.constant 0 : index
      %89 = vector.load %arg7[%c0_32, %c0_33] : memref<1x256xf32, #tpu.memory_space<vmem>>, vector<1x256xf32>
      %90 = arith.addf %89, %74 : vector<1x256xf32>
      %c0_34 = arith.constant 0 : index
      %c0_35 = arith.constant 0 : index
      %91 = vector.load %arg7[%c0_34, %c0_35] : memref<1x256xf32, #tpu.memory_space<vmem>>, vector<1x256xf32>
      tpu.vector_store %arg7[%c0_34, %c0_35], %90 {strides = array<i32>} : memref<1x256xf32, #tpu.memory_space<vmem>>, vector<1x256xf32>,
      %c0_36 = arith.constant 0 : index
      %c0_37 = arith.constant 0 : index
      %92 = vector.load %arg8[%c0_36, %c0_37] : memref<1x256xf32, #tpu.memory_space<vmem>>, vector<1x256xf32>
      %93 = arith.addf %92, %76 : vector<1x256xf32>
      %c0_38 = arith.constant 0 : index
      %c0_39 = arith.constant 0 : index
      %94 = vector.load %arg8[%c0_38, %c0_39] : memref<1x256xf32, #tpu.memory_space<vmem>>, vector<1x256xf32>
      tpu.vector_store %arg8[%c0_38, %c0_39], %93 {strides = array<i32>} : memref<1x256xf32, #tpu.memory_space<vmem>>, vector<1x256xf32>,
      %c0_40 = arith.constant 0 : index
      %c0_41 = arith.constant 0 : index
      %95 = vector.load %arg9[%c0_40, %c0_41] : memref<1x256xf32, #tpu.memory_space<vmem>>, vector<1x256xf32>
      %96 = arith.addf %95, %73 : vector<1x256xf32>
      %c0_42 = arith.constant 0 : index
      %c0_43 = arith.constant 0 : index
      %97 = vector.load %arg9[%c0_42, %c0_43] : memref<1x256xf32, #tpu.memory_space<vmem>>, vector<1x256xf32>
      tpu.vector_store %arg9[%c0_42, %c0_43], %96 {strides = array<i32>} : memref<1x256xf32, #tpu.memory_space<vmem>>, vector<1x256xf32>,
      %c0_44 = arith.constant 0 : index
      %c0_45 = arith.constant 0 : index
      %98 = vector.load %arg10[%c0_44, %c0_45] : memref<1x256xf32, #tpu.memory_space<vmem>>, vector<1x256xf32>
      %99 = arith.addf %98, %79 : vector<1x256xf32>
      %c0_46 = arith.constant 0 : index
      %c0_47 = arith.constant 0 : index
      %100 = vector.load %arg10[%c0_46, %c0_47] : memref<1x256xf32, #tpu.memory_space<vmem>>, vector<1x256xf32>
      tpu.vector_store %arg10[%c0_46, %c0_47], %99 {strides = array<i32>} : memref<1x256xf32, #tpu.memory_space<vmem>>, vector<1x256xf32>,
      %c0_48 = arith.constant 0 : index
      %c0_49 = arith.constant 0 : index
      %101 = vector.load %arg11[%c0_48, %c0_49] : memref<1x256xf32, #tpu.memory_space<vmem>>, vector<1x256xf32>
      %102 = arith.maximumf %101, %12 : vector<1x256xf32>
      %c0_50 = arith.constant 0 : index
      %c0_51 = arith.constant 0 : index
      %103 = vector.load %arg11[%c0_50, %c0_51] : memref<1x256xf32, #tpu.memory_space<vmem>>, vector<1x256xf32>
      tpu.vector_store %arg11[%c0_50, %c0_51], %102 {strides = array<i32>} : memref<1x256xf32, #tpu.memory_space<vmem>>, vector<1x256xf32>,
    } else {
    }
    %c0_i32_30 = arith.constant 0 : i32
    %86 = arith.cmpi eq, %arg2, %c0_i32_30 : i32
    %87 = arith.extui %86 : i1 to i32
    %c0_i32_31 = arith.constant 0 : i32
    %88 = arith.cmpi ne, %87, %c0_i32_31 : i32
    scf.if %88 {
      %89 = tpu.iota {dimensions = array<i32: 2>} : vector<1x1x8x128xi32>
      %c0_i32_32 = arith.constant 0 : i32
      %90 = vector.broadcast %c0_i32_32 : i32 to vector<1x1x8x128xi32>
      %91 = arith.cmpi eq, %89, %90 : vector<1x1x8x128xi32>
      %c0_33 = arith.constant 0 : index
      %c0_34 = arith.constant 0 : index
      %92 = vector.load %arg7[%c0_33, %c0_34] : memref<1x256xf32, #tpu.memory_space<vmem>>, vector<1x256xf32>
      %93 = vector.shape_cast %92 : vector<1x256xf32> to vector<1x1x256xf32>
      %cst_35 = arith.constant dense<0.000000e+00> : vector<1xf32>
      %94 = vector.multi_reduction <add>, %93, %cst_35 [1, 2] : vector<1x1x256xf32> to vector<1xf32>
      %95 = vector.shape_cast %94 : vector<1xf32> to vector<1x1x1xf32>
      %96 = vector.extract %95[0, 0, 0] : f32 from vector<1x1x1xf32>
      %c1_i32_36 = arith.constant 1 : i32
      %97 = vector.broadcast %c1_i32_36 : i32 to vector<1x1x8x128xi32>
      %98 = arith.cmpi eq, %89, %97 : vector<1x1x8x128xi32>
      %c0_37 = arith.constant 0 : index
      %c0_38 = arith.constant 0 : index
      %99 = vector.load %arg8[%c0_37, %c0_38] : memref<1x256xf32, #tpu.memory_space<vmem>>, vector<1x256xf32>
      %100 = vector.shape_cast %99 : vector<1x256xf32> to vector<1x1x256xf32>
      %cst_39 = arith.constant dense<0.000000e+00> : vector<1xf32>
      %101 = vector.multi_reduction <add>, %100, %cst_39 [1, 2] : vector<1x1x256xf32> to vector<1xf32>
      %102 = vector.shape_cast %101 : vector<1xf32> to vector<1x1x1xf32>
      %103 = vector.extract %102[0, 0, 0] : f32 from vector<1x1x1xf32>
      %c2_i32 = arith.constant 2 : i32
      %104 = vector.broadcast %c2_i32 : i32 to vector<1x1x8x128xi32>
      %105 = arith.cmpi eq, %89, %104 : vector<1x1x8x128xi32>
      %c0_40 = arith.constant 0 : index
      %c0_41 = arith.constant 0 : index
      %106 = vector.load %arg9[%c0_40, %c0_41] : memref<1x256xf32, #tpu.memory_space<vmem>>, vector<1x256xf32>
      %107 = vector.shape_cast %106 : vector<1x256xf32> to vector<1x1x256xf32>
      %cst_42 = arith.constant dense<0.000000e+00> : vector<1xf32>
      %108 = vector.multi_reduction <add>, %107, %cst_42 [1, 2] : vector<1x1x256xf32> to vector<1xf32>
      %109 = vector.shape_cast %108 : vector<1xf32> to vector<1x1x1xf32>
      %110 = vector.extract %109[0, 0, 0] : f32 from vector<1x1x1xf32>
      %c3_i32_43 = arith.constant 3 : i32
      %111 = vector.broadcast %c3_i32_43 : i32 to vector<1x1x8x128xi32>
      %112 = arith.cmpi eq, %89, %111 : vector<1x1x8x128xi32>
      %c0_44 = arith.constant 0 : index
      %c0_45 = arith.constant 0 : index
      %113 = vector.load %arg10[%c0_44, %c0_45] : memref<1x256xf32, #tpu.memory_space<vmem>>, vector<1x256xf32>
      %114 = vector.shape_cast %113 : vector<1x256xf32> to vector<1x1x256xf32>
      %cst_46 = arith.constant dense<0.000000e+00> : vector<1xf32>
      %115 = vector.multi_reduction <add>, %114, %cst_46 [1, 2] : vector<1x1x256xf32> to vector<1xf32>
      %116 = vector.shape_cast %115 : vector<1xf32> to vector<1x1x1xf32>
      %117 = vector.extract %116[0, 0, 0] : f32 from vector<1x1x1xf32>
      %c0_47 = arith.constant 0 : index
      %c0_48 = arith.constant 0 : index
      %118 = vector.load %arg11[%c0_47, %c0_48] : memref<1x256xf32, #tpu.memory_space<vmem>>, vector<1x256xf32>
      %119 = vector.shape_cast %118 : vector<1x256xf32> to vector<1x1x256xf32>
      %cst_49 = arith.constant dense<0xFF800000> : vector<1xf32>
      %120 = vector.multi_reduction <maximumf>, %119, %cst_49 [1, 2] : vector<1x1x256xf32> to vector<1xf32>
      %121 = vector.shape_cast %120 : vector<1xf32> to vector<1x1x1xf32>
      %122 = vector.extract %121[0, 0, 0] : f32 from vector<1x1x1xf32>
      %123 = vector.broadcast %117 : f32 to vector<1x1x8x128xf32>
      %124 = vector.broadcast %122 : f32 to vector<1x1x8x128xf32>
      %125 = arith.select %112, %123, %124 : vector<1x1x8x128xi1>, vector<1x1x8x128xf32>
      %126 = vector.broadcast %110 : f32 to vector<1x1x8x128xf32>
      %127 = arith.select %105, %126, %125 : vector<1x1x8x128xi1>, vector<1x1x8x128xf32>
      %128 = vector.broadcast %103 : f32 to vector<1x1x8x128xf32>
      %129 = arith.select %98, %128, %127 : vector<1x1x8x128xi1>, vector<1x1x8x128xf32>
      %130 = vector.broadcast %96 : f32 to vector<1x1x8x128xf32>
      %131 = arith.select %91, %130, %129 : vector<1x1x8x128xi1>, vector<1x1x8x128xf32>
      %c0_50 = arith.constant 0 : index
      %c0_51 = arith.constant 0 : index
      %c0_52 = arith.constant 0 : index
      %c0_53 = arith.constant 0 : index
      %132 = vector.load %arg6[%c0_50, %c0_51, %c0_52, %c0_53] : memref<1x1x8x128xf32, #tpu.memory_space<vmem>>, vector<1x1x8x128xf32>
      tpu.vector_store %arg6[%c0_50, %c0_51, %c0_52, %c0_53], %131 {strides = array<i32>} : memref<1x1x8x128xf32, #tpu.memory_space<vmem>>, vector<1x1x8x128xf32>,
    } else {
    }
    return
  }
  func.func @transform_0(%arg0: i32, %arg1: i32, %arg2: i32) -> (i32, i32, i32) {
    %c1_i32 = arith.constant 1 : i32
    %0 = arith.muli %arg1, %c1_i32 : i32
    %1 = arith.addi %0, %arg2 : i32
    %c0_i32 = arith.constant 0 : i32
    %2 = arith.minsi %1, %c0_i32 : i32
    %c0_i32_0 = arith.constant 0 : i32
    %c0_i32_1 = arith.constant 0 : i32
    return %arg0, %c0_i32_0, %2 : i32, i32, i32
  }
  func.func @transform_1(%arg0: i32, %arg1: i32, %arg2: i32) -> (i32, i32, i32) {
    %c1_i32 = arith.constant 1 : i32
    %0 = arith.muli %arg1, %c1_i32 : i32
    %1 = arith.addi %0, %arg2 : i32
    %c0_i32 = arith.constant 0 : i32
    %2 = arith.minsi %1, %c0_i32 : i32
    %c0_i32_0 = arith.constant 0 : i32
    %c0_i32_1 = arith.constant 0 : i32
    return %arg0, %c0_i32_0, %2 : i32, i32, i32
  }
  func.func @transform_2(%arg0: i32, %arg1: i32, %arg2: i32) -> (i32, i32, i32) {
    %c1_i32 = arith.constant 1 : i32
    %0 = arith.muli %arg1, %c1_i32 : i32
    %1 = arith.addi %0, %arg2 : i32
    %c0_i32 = arith.constant 0 : i32
    %2 = arith.minsi %1, %c0_i32 : i32
    %c0_i32_0 = arith.constant 0 : i32
    %c0_i32_1 = arith.constant 0 : i32
    return %arg0, %c0_i32_0, %2 : i32, i32, i32
  }
  func.func @transform_3(%arg0: i32, %arg1: i32, %arg2: i32) -> (i32, i32, i32, i32) {
    %c0_i32 = arith.constant 0 : i32
    %c0_i32_0 = arith.constant 0 : i32
    %c0_i32_1 = arith.constant 0 : i32
    return %arg0, %arg1, %c0_i32, %c0_i32_0 : i32, i32, i32, i32
  }
}

</mosaic_0001>

<bundles_post_ra>
// kernel: tpu_custom_call.1
= control target key start
LH: loop header
LB: loop body
LE: loop exit
PB: predicated region body
PF: predicated region fallthrough
CT: control target
= control target key end

     0   :  { %8 = vsyncpa [#allocation8], 0  ;;  %s1491_s0 = inlined_call_operand.vmem [shape: f32[2,17,256], index: 0, kind: input, shape index: {}]   ;;  %s1492_s1 = inlined_call_operand.vmem [shape: s32[2,1,256], index: 1, kind: input, shape index: {}]   ;;  %s1493_s2 = inlined_call_operand.vmem [shape: f32[2,1,256], index: 2, kind: input, shape index: {}]   ;;  %s1494_s3 = inlined_call_operand.hbm [shape: f32[2,2,8,128], index: 3, kind: output, shape index: {}]  }
   0x1   :  { %10 = vsyncpa [#allocation8 + $0x1], 0  ;;  %s1154_s12 = smov 0   ;;  %s1156_s13 = smov 0  }
   0x2   :  { %s1158_s14 = smov 0   ;;  %s1160_s15 = smov 0  }
   0x3   :  { %s1162_s16 = smov 0   ;;  %s1164_s17 = smov 0  }
   0x4   :  { %s1166_s18 = smov 0   ;;  %s1168_s19 = smov 0  }
   0x5 LB: > { %s903_s20 = sadd.s32 4294967295, %s1130_s19   ;;  %s904_s21 = sadd.s32 4294967294, %s1130_s19   ;;  %s1130_s19 = sphi %s1168_s19, %s16_s19   ;;  %s1126_s18 = sphi %s1166_s18, %s1513_s18   ;;  %s1122_s17 = sphi %s1164_s17, %s1512_s17   ;;  %s1118_s16 = sphi %s1162_s16, %s1511_s16   ;;  %s1114_s15 = sphi %s1160_s15, %s1510_s15   ;;  %s1110_s14 = sphi %s1158_s14, %s1509_s14   ;;  %s1106_s13 = sphi %s1156_s13, %s1508_s13   ;;  %s1102_s12 = sphi %s1154_s12, %s1507_s12  }
   0x6   : > { %s31_s22 = sadd.s32 1, %s1122_s17  ;;  %s35_s23 = sadd.s32 1, %s1126_s18 }
   0x7   : > { %p33_p0 = scmp.ge.s32.totalorder %s31_s22, 2  ;;  %p156_p1 = scmp.ne.s32.totalorder %s1110_s14, %s1106_s13 }
   0x8   : > { %p157_p2 = scmp.eq.s32.totalorder %s903_s20, 3  ;;  %p162_p5 = scmp.ne.s32.totalorder %s1106_s13, %s1102_s12 }
   0x9   : > { %s1515_s22 = smov (%p33_p0, %s31_s22), 0  ;;  %s1517_s23 = smov (!%p33_p0, %s35_s23), %s1126_s18 }
   0xa   : > { %s142_s24 = ssub.s32 %s1122_s17, %s1515_s22  ;;  %p1205_p3 = por %p157_p2, %p156_p1 }
   0xb   : > { %p37_p4 = scmp.ge.s32.totalorder %s1517_s23, 2  ;;  %p163_p6 = scmp.eq.s32.totalorder %s904_s21, 3 }
   0xc   : > { %p907_p7 = scmp.ge.s32.totalorder %s1130_s19, 1  ;;  %p236_p9 = scmp.lt.s32.totalorder %s1130_s19, 5 }
   0xd   : > { %s1519_s23 = smov (%p37_p4, %s1517_s23), 0  ;;  %p1214_p8 = por %p163_p6, %p162_p5 }
   0xe   : > { %s141_s27 = ssub.s32 %s1126_s18, %s1519_s23  ;;  %s146_s28 = sadd.s32 1, %s1110_s14 }
   0xf   : > { %s143_s29 = sor.u32 %s142_s24, %s141_s27  ;;  %p237_p10 = pnand %p907_p7, %p236_p9 }
  0x10   : > { %p144_p11 = scmp.eq.s32.totalorder %s143_s29, 0  ;;  %s286_s4 = sand.u32 (!%p237_p10), 1, %s1106_s13  }
  0x11   : > { %240 = sbr.rel (%p237_p10) target bundleno = 360 (0x168), region = 32  ;;  %p290_p12 = scmp.lt.s32.totalorder (!%p237_p10), %s1114_s15, 0 }
  0x12   : > { %s1223_s30 = scalar_select %p144_p11, %s1110_s14, %s146_s28  }
  0x13   : > { %s1229_s5 = sshll.u32 (!%p237_p10), %s286_s4, 3  ;;  %p293_p13 = scmp.lt.s32.totalorder (!%p237_p10), %s1118_s16, 1 }
  0x14   : > { %p916_p1 = scmp.lt.s32.totalorder (!%p237_p10), %s1114_s15, 1 }
  0x16   : > { %v340_v0 = vlaneseq  ;;  %s291_s6 = scalar_select %p290_p12, %s1114_s15, 0  ;;  %v1132_v2 = vmov 0.0   ;;  %vm387_vm1 = vcmask 1040384  }
  0x17   : > { %s1242_s7 = scalar_select %p293_p13, %s1118_s16, 1 }
  0x18   : > { %vm1233_vm0 = vcmp.lt.s32.totalorder %v340_v0, 256  ;;  %s909_s8 = sshll.u32 %s291_s6, 1  ;;  %s917_s20 = sshll.u32 (!%p916_p1), %s1114_s15, 8 }
  0x19   : > { %344 = vst.msk [vmem:[#allocation2] sm:$0x3] %vm1233_vm0, %v1132_v2  ;;  %p295_p0 = scmp.lt.s32.totalorder %s909_s8, 1  ;;  %s924_s9 = smul.u32 6, %s1242_s7 }
  0x1a   : > { %345 = vst.msk [vmem:[#allocation3] sm:$0x3] %vm1233_vm0, %v1132_v2  ;;  %s912_s27 = sshll.u32 %s1242_s7, 1 }
  0x1b   : > { %346 = vst.msk [vmem:[#allocation4] sm:$0x3] %vm1233_vm0, %v1132_v2  ;;  %s1521_s8 = smov (!%p295_p0, %s909_s8), 1 }
  0x1c   : > { %347 = vst.msk [vmem:[#allocation5] sm:$0x3] %vm1233_vm0, %v1132_v2  ;;  %s298_s10 = sadd.s32 %s924_s9, %s1521_s8  ;;  %s1281_s28 = sadd.s32 %s912_s27, %s1521_s8 }
  0x1d   : > { %348 = vst.msk [vmem:[#allocation6] sm:$0x3] %vm1233_vm0, %v1132_v2  ;;  %s910_s11 = sshll.u32 %s298_s10, 3  ;;  %s330_s9 = scalar_lea.vmem %s1493_s2, %s1281_s28 }
  0x1e   : > { %s300_s24 = scalar_lea.vmem %s1491_s0, %s910_s11  ;;  %v1287_v55 = vld [vmem:[%s330_s9] sm:$0x3]  ;;  %s315_s10 = scalar_lea.vmem %s1492_s1, %s1281_s28 }
  0x1f   : > { %v349_v3 = vld [vmem:[%s300_s24] sm:$0xff]  ;;  %v350_v4 = vld [vmem:[%s300_s24 + $0x8] sm:$0xff]  ;;  %v351_v5 = vld [vmem:[%s300_s24 + $0x10] sm:$0xff]  ;;  %vm532_vm2 = vcmp.eq.f32.partialorder %v1287_v55, 0.0  ;;  %vm539_vm9 = vweird.f32 %v1287_v55  ;;  %s288_s11 = scalar_lea.vmem [#allocation7], %s1229_s5 }
  0x20   : > { %v352_v6 = vld [vmem:[%s300_s24 + $0x18] sm:$0xff]  ;;  %v357_v7 = vmax.f32 %v349_v3, %v351_v5  ;;  %v915_v15 = vld [vmem:[%s300_s24 + $0x20] ss:$8 sm:$0x3] }
  0x21   : > { %v364_v8 = vmax.f32 %v350_v4, %v352_v6  ;;  %v372_v19 = vperm.slane %v915_v15, 0  ;;  %v373_v21 = vperm.slane %v915_v15, 1 }
  0x22   : > { %v358_v9 = vrot.slane %v357_v7, 4 }
  0x23   : > { %v365_v10 = vrot.slane %v364_v8, 4 }
  0x24   : > { %v359_v11 = vmax.f32 %v357_v7, %v358_v9 }
  0x25   : > { %v366_v12 = vmax.f32 %v364_v8, %v365_v10 }
  0x26   : > { %v360_v13 = vrot.slane %v359_v11, 2 }
  0x27   : > { %v367_v14 = vrot.slane %v366_v12, 2 }
  0x28   : > { %v361_v16 = vmax.f32 %v359_v11, %v360_v13 }
  0x29   : > { %v368_v17 = vmax.f32 %v366_v12, %v367_v14  ;;  %v1296_v14 = vld [vmem:[%s315_s10] sm:$0x3] }
  0x2a   : > { %v362_v18 = vrot.slane %v361_v16, 1  ;;  %vm492_vm12 = vcmp.eq.s32.totalorder %v1296_v14, 16 }
  0x2b   : > { %v369_v20 = vrot.slane %v368_v17, 1 }
  0x2c   : > { %v363_v22 = vmax.f32 %v361_v16, %v362_v18 }
  0x2d   : > { %v370_v23 = vmax.f32 %v368_v17, %v369_v20 }
  0x2e   : > { %v376_v24 = vmax.f32 %v363_v22, %v372_v19 }
  0x2f   : > { %v377_v25 = vmax.f32 %v370_v23, %v373_v21  ;;  %v1299_v23 = vshrl.u32 %v340_v0, 7 }
  0x30   : > { %v378_v26 = vperm.slane %v376_v24, 0 }
  0x31   : > { %v379_v27 = vperm.slane %v377_v25, 0  ;;  %v386_v30 = vrot.slane %v377_v25, 7  ;;  %v483_v25 = vperm.slane %v1296_v14, 1  ;;  %vm501_vm3 = vcmp.eq.s32.totalorder %v1299_v23, 3 }
  0x32   : > { %v1263_v28 = vsub.f32 %v349_v3, %v378_v26  ;;  %v1265_v29 = vsub.f32 %v351_v5, %v378_v26  ;;  %vm499_vm6 = vcmp.lt.s32.totalorder %v1299_v23, 3 }
  0x33   : > { %v1267_v31 = vsub.f32 %v350_v4, %v379_v27  ;;  %v1269_v32 = vsub.f32 %v352_v6, %v379_v27  ;;  %v388_v37 = vsel %vm387_vm1, %v376_v24, %v386_v30  ;;  %vm1317_vm4 = vcmp.eq.s32.totalorder %v1299_v23, %v483_v25 }
  0x34   : > { %v391_v33 = vmul.f32 1.442695, %v1263_v28  ;;  %v395_v34 = vmul.f32 1.442695, %v1265_v29  ;;  %v1276_v38 = vsub.f32 %v915_v15, %v388_v37 }
  0x35   : > { %v393_v35 = vmul.f32 1.442695, %v1267_v31  ;;  %v397_v36 = vmul.f32 1.442695, %v1269_v32 }
  0x36   : > { %1008 = vpow2.f32 %v391_v33  ;;  %v399_v41 = vmul.f32 1.442695, %v1276_v38  ;;  %v482_v33 = vperm.slane %v1296_v14, 0 }
  0x37   : > { %1010 = vpow2.f32 %v393_v35  ;;  %v1311_v35 = vsel %vm532_vm2, 1.0, %v1132_v2 }
  0x38   : > { %1012 = vpow2.f32 %v395_v34  ;;  %vm1325_vm5 = vcmp.eq.s32.totalorder %v1299_v23, %v482_v33 }
  0x39   : > { %1014 = vpow2.f32 %v397_v36 }
  0x3a   : > { %1016 = vpow2.f32 %v399_v41 }
  0x3b   : > { %1018 = vrsqrt.f32 %v1287_v55 }
  0x3c   : > { %v1009_v39 = vpop.eup %1008 }
  0x3d   : > { %v1011_v40 = vpop.eup %1010 }
  0x3e   : > { %v1013_v42 = vpop.eup %1012 }
  0x3f   : > { %v1015_v43 = vpop.eup %1014  ;;  %v401_v44 = vadd.f32 %v1013_v42, %v1009_v39 }
  0x40   : > { %v408_v45 = vadd.f32 %v1015_v43, %v1011_v40  ;;  %v1017_v52 = vpop.eup %1016 }
  0x41   : > { %v402_v46 = vrot.slane %v401_v44, 4  ;;  %v416_v57 = vperm.slane %v1017_v52, 0  ;;  %v417_v59 = vperm.slane %v1017_v52, 1  ;;  %v1294_v13 = vpop.eup %1018 }
  0x42   : > { %v409_v47 = vrot.slane %v408_v45, 4  ;;  %v534_v26 = vmul.f32 %v1294_v13, %v1287_v55  ;;  %vm540_vm10 = vweird.f32 %v1294_v13 }
  0x43   : > { %v403_v48 = vadd.f32 %v402_v46, %v401_v44  ;;  %vm541_vm11 = vmor %vm539_vm9, %vm540_vm10 }
  0x44   : > { %v410_v49 = vadd.f32 %v409_v47, %v408_v45 }
  0x45   : > { %v404_v50 = vrot.slane %v403_v48, 2 }
  0x46   : > { %v411_v51 = vrot.slane %v410_v49, 2 }
  0x47   : > { %v405_v53 = vadd.f32 %v404_v50, %v403_v48  ;;  %v1133_v50 = vmov 1.0  }
  0x48   : > { %v412_v54 = vadd.f32 %v411_v51, %v410_v49  ;;  %v503_v51 = vsel %vm501_vm3, 2.0, %v1133_v50 }
  0x49   : > { %v406_v56 = vrot.slane %v405_v53, 1 }
  0x4a   : > { %v413_v58 = vrot.slane %v412_v54, 1 }
  0x4b   : > { %v407_v60 = vadd.f32 %v406_v56, %v405_v53 }
  0x4c   : > { %v414_v61 = vadd.f32 %v413_v58, %v412_v54 }
  0x4d   : > { %v420_v62 = vadd.f32 %v416_v57, %v407_v60 }
  0x4e   : > { %v421_v63 = vadd.f32 %v417_v59, %v414_v61 }
  0x4f   : > { %1020 = vlog2.f32 %v420_v62  ;;  %v443_v3 = vperm.slane %v420_v62, 0  ;;  %v449_v4 = vmul.f32 1e-25, %v420_v62  ;;  %v469_v5 = vsub.f32 %v420_v62, %v416_v57 }
  0x50   : > { %1022 = vlog2.f32 %v421_v63  ;;  %v444_v6 = vperm.slane %v421_v63, 0  ;;  %v450_v7 = vmul.f32 1e-25, %v421_v63  ;;  %v470_v8 = vsub.f32 %v421_v63, %v417_v59 }
  0x51   : > { %v445_v9 = vsub.f32 %v443_v3, %v1009_v39  ;;  %v447_v10 = vsub.f32 %v443_v3, %v1013_v42  ;;  %v451_v11 = vperm.slane %v449_v4, 0  ;;  %v471_v12 = vmax.f32 %v469_v5, %v449_v4 }
  0x52   : > { %v446_v15 = vsub.f32 %v444_v6, %v1011_v40  ;;  %v448_v16 = vsub.f32 %v444_v6, %v1015_v43  ;;  %v452_v17 = vperm.slane %v450_v7, 0  ;;  %v472_v18 = vmax.f32 %v470_v8, %v450_v7 }
  0x53   : > { %v453_v19 = vmax.f32 %v445_v9, %v451_v11  ;;  %v455_v20 = vmax.f32 %v447_v10, %v451_v11  ;;  %1024 = vlog2.f32 %v471_v12  ;;  %v481_v40 = vadd.s32 8, %v1299_v23 }
  0x54   : > { %v454_v21 = vmax.f32 %v446_v15, %v452_v17  ;;  %v456_v22 = vmax.f32 %v448_v16, %v452_v17  ;;  %1026 = vlog2.f32 %v472_v18  ;;  %v535_v42 = vmul.f32 %v1294_v13, %v534_v26 }
  0x55   : > { %v1021_v24 = vpop.eup %1020  ;;  %1028 = vlog2.f32 %v453_v19  ;;  %vm1334_vm7 = vcmp.eq.s32.totalorder %v481_v40, %v482_v33  ;;  %vm1338_vm8 = vcmp.eq.s32.totalorder %v481_v40, %v483_v25  ;;  %v505_v63 = vsel %vm499_vm6, 3.0, %v503_v51 }
  0x56   : > { %v1023_v27 = vpop.eup %1022  ;;  %v1304_v30 = vmul.f32 0.6931472, %v1021_v24  ;;  %1030 = vlog2.f32 %v454_v21 }
  0x57   : > { %v425_v34 = vmul.f32 0.6931472, %v1023_v27  ;;  %1032 = vlog2.f32 %v455_v20 }
  0x58   : > { %v426_v36 = vperm.slane %v1304_v30, 0  ;;  %1034 = vlog2.f32 %v456_v22 }
  0x59   : > { %v1025_v37 = vpop.eup %1024  ;;  %v427_v39 = vperm.slane %v425_v34, 0  ;;  %v438_v49 = vrot.slane %v425_v34, 7 }
  0x5a   : > { %v1027_v43 = vpop.eup %1026  ;;  %v428_v2 = vsub.f32 %v1263_v28, %v426_v36  ;;  %v430_v44 = vsub.f32 %v1265_v29, %v426_v36  ;;  %v474_v6 = vmul.f32 0.6931472, %v1025_v37 }
  0x5b   : > { %v1029_v46 = vpop.eup %1028  ;;  %v429_v47 = vsub.f32 %v1267_v31, %v427_v39  ;;  %v431_v48 = vsub.f32 %v1269_v32, %v427_v39  ;;  %v476_v53 = vmul.f32 0.6931472, %v1027_v43  ;;  %v536_v32 = vmul.f32 0.5, %v535_v42 }
  0x5c   : > { %v1031_v28 = vpop.eup %1030  ;;  %v432_v52 = vmax.f32 %v428_v2, -57.56463  ;;  %v458_v29 = vmul.f32 0.6931472, %v1029_v46  ;;  %v434_v60 = vmax.f32 %v430_v44, -57.56463  ;;  %v439_v7 = vsel %vm387_vm1, %v1304_v30, %v438_v49 }
  0x5d   : > { %v1033_v56 = vpop.eup %1032  ;;  %v433_v57 = vmax.f32 %v429_v47, -57.56463  ;;  %v460_v58 = vmul.f32 0.6931472, %v1031_v28  ;;  %v435_v3 = vmax.f32 %v431_v48, -57.56463  ;;  %v478_v9 = vsub.f32 %v476_v53, %v425_v34 }
  0x5e   : > { %v1035_v59 = vpop.eup %1034  ;;  %v462_v61 = vmul.f32 0.6931472, %v1033_v56  ;;  %v465_v62 = vsub.f32 %v458_v29, %v426_v36  ;;  %v537_v16 = vsub.f32 1.5, %v536_v32  ;;  %v441_v19 = vsub.f32 %v1276_v38, %v439_v7 }
  0x5f   : > { %v464_v4 = vmul.f32 0.6931472, %v1035_v59  ;;  %v466_v5 = vsub.f32 %v460_v58, %v427_v39  ;;  %v477_v22 = vsub.f32 %v474_v6, %v1304_v30  ;;  %v495_v24 = vrot.slane %v478_v9, 7 }
  0x60   : > { %v467_v8 = vsub.f32 %v462_v61, %v426_v36  ;;  %v488_v10 = vsel %vm1325_vm5, %v432_v52, %v465_v62  ;;  %v538_v27 = vmul.f32 %v1294_v13, %v537_v16  ;;  %v442_v34 = vmax.f32 %v441_v19, -57.56463 }
  0x61   : > { %v468_v11 = vsub.f32 %v464_v4, %v427_v39  ;;  %v489_v12 = vsel %vm1317_vm4, %v433_v57, %v466_v5  ;;  %v507_v15 = vmul.f32 %v505_v63, %v488_v10  ;;  %v496_v38 = vsel %vm387_vm1, %v477_v22, %v495_v24 }
  0x62   : > { %v490_v17 = vsel %vm1334_vm7, %v434_v60, %v467_v8  ;;  %v508_v18 = vmul.f32 %v505_v63, %v489_v12  ;;  %v542_v40 = vsel %vm541_vm11, %v1294_v13, %v538_v27  ;;  %v498_v42 = vsel %vm492_vm12, %v442_v34, %v496_v38 }
  0x63   : > { %v491_v20 = vsel %vm1338_vm8, %v435_v3, %v468_v11  ;;  %v511_v21 = vadd.f32 %v507_v15, %v490_v17  ;;  %v1364_v2 = vsel %vm532_vm2, 0.0, %v542_v40  ;;  %v526_v45 = vperm.slane %v498_v42, 0 }
  0x64   : > { %v518_v25 = vadd.f32 %v508_v18, %v491_v20  ;;  %v527_v47 = vperm.slane %v498_v42, 1  ;;  %v545_v48 = vperm.slane %v1364_v2, 0  ;;  %v546_v50 = vperm.slane %v1364_v2, 1 }
  0x65   : > { %v512_v26 = vrot.slane %v511_v21, 4 }
  0x66   : > { %v519_v33 = vrot.slane %v518_v25, 4 }
  0x67   : > { %v513_v36 = vadd.f32 %v512_v26, %v511_v21 }
  0x68   : > { %v520_v37 = vadd.f32 %v519_v33, %v518_v25 }
  0x69   : > { %v514_v39 = vrot.slane %v513_v36, 2 }
  0x6a   : > { %v521_v41 = vrot.slane %v520_v37, 2 }
  0x6b   : > { %v515_v30 = vadd.f32 %v514_v39, %v513_v36 }
  0x6c   : > { %v522_v43 = vadd.f32 %v521_v41, %v520_v37 }
  0x6d   : > { %v516_v44 = vrot.slane %v515_v30, 1 }
  0x6e   : > { %v523_v46 = vrot.slane %v522_v43, 1 }
  0x6f   : > { %v517_v14 = vadd.f32 %v516_v44, %v515_v30 }
  0x70   : > { %v524_v49 = vadd.f32 %v523_v46, %v522_v43 }
  0x71   : > { %v530_v13 = vadd.f32 %v526_v45, %v517_v14 }
  0x72   : > { %v531_v51 = vadd.f32 %v527_v47, %v524_v49 }
  0x73   : > { %v1368_v28 = vmul.f32 %v545_v48, %v530_v13  ;;  %561 = sbr.rel (%p916_p1) target bundleno = 138 (0x8a), region = 40 }
  0x74   : > { %v1370_v52 = vmul.f32 %v546_v50, %v531_v51  ;;  %v553_v29 = vrot.slane %v531_v51, 7 }
  0x76   : > { %v554_v53 = vsel %vm387_vm1, %v530_v13, %v553_v29 }
  0x77   : > { %v556_v54 = vsel %vm532_vm2, %v554_v53, 0.0 }
  0x78   : > { %v564_v56 = vand.u32 127, %v340_v0  ;;  %v566_v57 = vstv %s917_s20  ;;  %v587_v32 = vperm.slane %v556_v54, 0  ;;  %v612_v59 = vperm.slane %v1311_v35, 0  ;;  %v571_v0 = vld [vmem:[#allocation2] sm:$0x3] }
  0x79   : > { %v588_v60 = vperm.slane %v556_v54, 1  ;;  %v613_v61 = vperm.slane %v1311_v35, 1  ;;  %v627_v3 = vperm.slane %v1287_v55, 0  ;;  %v628_v4 = vperm.slane %v1287_v55, 1  ;;  %v585_v9 = vld [vmem:[#allocation3] sm:$0x3] }
  0x7a   : > { %v565_v58 = vadd.s32 128, %v564_v56  ;;  %v567_v31 = vadd.s32 %v566_v57, %v564_v56  ;;  %v600_v17 = vld [vmem:[#allocation4] sm:$0x3]  ;;  %v610_v20 = vld [vmem:[#allocation5] sm:$0x3] }
  0x7b   : > { %v625_v37 = vld [vmem:[#allocation6] sm:$0x3] }
  0x7c   : > { %v568_v62 = vadd.s32 %v566_v57, %v565_v58  ;;  %vm569_vm13 = vcmp.lt.s32.totalorder %v567_v31, 256 }
  0x7d   : > { %v572_v63 = vsel %vm569_vm13, %v1368_v28, 0.0  ;;  %v591_v5 = vsel %vm569_vm13, %v587_v32, 0.0  ;;  %v601_v6 = vsel %vm569_vm13, %v545_v48, 0.0  ;;  %v616_v7 = vsel %vm569_vm13, %v612_v59, 0.0 }
  0x7e   : > { %vm570_vm14 = vcmp.lt.s32.totalorder %v568_v62, 256  ;;  %v631_v36 = vsel %vm569_vm13, %v627_v3, 0.0 }
  0x7f   : > { %v573_v8 = vsel %vm570_vm14, %v1370_v52, 0.0  ;;  %v592_v10 = vsel %vm570_vm14, %v588_v60, 0.0  ;;  %v602_v11 = vsel %vm570_vm14, %v546_v50, 0.0  ;;  %v617_v12 = vsel %vm570_vm14, %v613_v61, 0.0 }
  0x80   : > { %v576_v15 = vrot.slane %v573_v8, 7  ;;  %v595_v16 = vrot.slane %v592_v10, 7  ;;  %v605_v18 = vrot.slane %v602_v11, 7  ;;  %v620_v19 = vrot.slane %v617_v12, 7 }
  0x81   : > { %v632_v21 = vsel %vm570_vm14, %v628_v4, 0.0 }
  0x82   : > { %v577_v22 = vsel %vm387_vm1, %v572_v63, %v576_v15  ;;  %v596_v24 = vsel %vm387_vm1, %v591_v5, %v595_v16  ;;  %v606_v25 = vsel %vm387_vm1, %v601_v6, %v605_v18  ;;  %v621_v26 = vsel %vm387_vm1, %v616_v7, %v620_v19 }
  0x83   : > { %v579_v27 = vadd.f32 %v577_v22, %v571_v0  ;;  %v598_v33 = vadd.f32 %v596_v24, %v585_v9  ;;  %v608_v34 = vadd.f32 %v606_v25, %v600_v17  ;;  %v623_v38 = vadd.f32 %v621_v26, %v610_v20 }
  0x84   : > { %v635_v39 = vrot.slane %v632_v21, 7 }
  0x85   : > { %584 = vst.msk [vmem:[#allocation2] sm:$0x3] %vm1233_vm0, %v579_v27 }
  0x86   : > { %599 = vst.msk [vmem:[#allocation3] sm:$0x3] %vm1233_vm0, %v598_v33  ;;  %v636_v40 = vsel %vm387_vm1, %v631_v36, %v635_v39 }
  0x87   : > { %609 = vst.msk [vmem:[#allocation4] sm:$0x3] %vm1233_vm0, %v608_v34  ;;  %v638_v41 = vmax.f32 %v625_v37, %v636_v40 }
  0x88   : > { %624 = vst.msk [vmem:[#allocation5] sm:$0x3] %vm1233_vm0, %v623_v38 }
  0x89   : > { %639 = vst.msk [vmem:[#allocation6] sm:$0x3] %vm1233_vm0, %v638_v41 }
  0x8a PF: > { %p918_p2 = scmp.ge.s32.totalorder %s1114_s15, 1 }
  0x8c   : > { %643 = sbr.rel (%p918_p2) target bundleno = 153 (0x99), region = 44 }
  0x91   : > { %v644_v42 = vld [vmem:[#allocation2] sm:$0x3]  ;;  %v647_v30 = vrot.slane %v1370_v52, 7  ;;  %v656_v43 = vld [vmem:[#allocation3] sm:$0x3] }
  0x92   : > { %v657_v44 = vadd.f32 %v656_v43, %v556_v54  ;;  %v659_v45 = vld [vmem:[#allocation4] sm:$0x3]  ;;  %v662_v46 = vld [vmem:[#allocation5] sm:$0x3]  ;;  %v665_v47 = vld [vmem:[#allocation6] sm:$0x3] }
  0x93   : > { %v648_v14 = vsel %vm387_vm1, %v1368_v28, %v647_v30  ;;  %v660_v48 = vadd.f32 %v659_v45, %v1364_v2  ;;  %v663_v49 = vadd.f32 %v662_v46, %v1311_v35  ;;  %v666_v13 = vmax.f32 %v665_v47, %v1287_v55 }
  0x94   : > { %v650_v50 = vadd.f32 %v648_v14, %v644_v42  ;;  %658 = vst.msk [vmem:[#allocation3] sm:$0x3] %vm1233_vm0, %v657_v44 }
  0x95   : > { %661 = vst.msk [vmem:[#allocation4] sm:$0x3] %vm1233_vm0, %v660_v48 }
  0x96   : > { %655 = vst.msk [vmem:[#allocation2] sm:$0x3] %vm1233_vm0, %v650_v50 }
  0x97   : > { %664 = vst.msk [vmem:[#allocation5] sm:$0x3] %vm1233_vm0, %v663_v49 }
  0x98   : > { %667 = vst.msk [vmem:[#allocation6] sm:$0x3] %vm1233_vm0, %v666_v13 }
  0x99 PF: > { %s920_s21 = sshll.u32 %s1118_s16, 1  ;;  %vm709_vm15 = vcmp.eq.s32.totalorder %v1299_v23, 2  ;;  %vm690_vm0 = vcmp.eq.s32.totalorder %v1299_v23, 1 }
  0x9a   : > { %s785_s24 = sadd.s32 %s1114_s15, %s920_s21  ;;  %s789_s15 = sshll.u32 %s288_s11, 4  ;;  %s790_s15 = int_to_ptr.vmem [resolvable:$true] %s789_s15 }
  0x9b   : > { %v691_v31 = vld [vmem:[#allocation3] sm:$0x3]  ;;  %s921_s27 = sshll.u32 %s785_s24, 3  ;;  %s775_s21 = scalar_lea.sflag [#allocation8], %s286_s4 }
  0x9c   : > { %v710_v35 = vld [vmem:[#allocation4] sm:$0x3]  ;;  %v693_v0 = vperm.slane %v691_v31, 0  ;;  %v694_v5 = vperm.slane %v691_v31, 1  ;;  %s787_s8 = scalar_lea.hbm %s1494_s3, %s921_s27 }
  0x9d   : > { %v672_v2 = vld [vmem:[#allocation2] sm:$0x3]  ;;  %v712_v28 = vperm.slane %v710_v35, 0  ;;  %v713_v52 = vperm.slane %v710_v35, 1  ;;  %s791_s16 = sshll.u32 %s787_s8, 4  ;;  %s792_s16 = int_to_ptr.hbm [resolvable:$true] %s791_s16 }
  0x9e   : > { %v674_v29 = vperm.slane %v672_v2, 0  ;;  %v675_v55 = vperm.slane %v672_v2, 1  ;;  %v728_v53 = vld [vmem:[#allocation5] sm:$0x3]  ;;  %v697_v8 = vsel %vm387_vm1, %v693_v0, 0.0  ;;  %v698_v9 = vsel %vm387_vm1, %v694_v5, 0.0 }
  0x9f   : > { %v746_v51 = vld [vmem:[#allocation6] sm:$0x3]  ;;  %v730_v57 = vperm.slane %v728_v53, 0  ;;  %v731_v58 = vperm.slane %v728_v53, 1  ;;  %v716_v32 = vsel %vm387_vm1, %v712_v28, 0.0  ;;  %v717_v59 = vsel %vm387_vm1, %v713_v52, 0.0 }
  0xa0   : > { %v748_v54 = vperm.slane %v746_v51, 0  ;;  %v749_v56 = vperm.slane %v746_v51, 1  ;;  %v678_v1 = vsel %vm387_vm1, %v674_v29, 0.0  ;;  %v679_v60 = vsel %vm387_vm1, %v675_v55, 0.0  ;;  %s1050_s24 = sshra.s32 %s792_s16, 4  ;;  %s1051_s24 = int_to_ptr.hbm [resolvable:$true] %s1050_s24 }
  0xa1   : > { %v718_v61 = vadd.f32 %v717_v59, %v716_v32  ;;  %v680_v62 = vadd.f32 %v679_v60, %v678_v1  ;;  %v734_v6 = vsel %vm387_vm1, %v730_v57, 0.0  ;;  %v735_v7 = vsel %vm387_vm1, %v731_v58, 0.0  ;;  %s1052_s27 = scalar_lea.hbm %s1051_s24, 8  ;;  %p1057_p7 = scmp.lt.s32.totalorder %s1051_s24, %s1494_s3 }
  0xa2   : > { %v752_v63 = vsel %vm387_vm1, %v748_v54, -inf  ;;  %v753_v3 = vsel %vm387_vm1, %v749_v56, -inf  ;;  %v736_v10 = vadd.f32 %v735_v7, %v734_v6  ;;  %v699_v11 = vadd.f32 %v698_v9, %v697_v8  ;;  %p1053_p4 = scmp.ne.s32.totalorder %s1051_s24, %s1052_s27 }
  0xa3   : > { %v754_v4 = vmax.f32 %v752_v63, %v753_v3  ;;  %719 = vadd.xlane.f32.xlu1 %v718_v61  ;;  %681 = vadd.xlane.f32.xlu0 %v680_v62  ;;  %vm671_vm1 = vcmp.eq.s32.totalorder %v1299_v23, 0 }
  0xa4   : > { %p1054_p5 = pnand %p1053_p4, %p1205_p3 }
  0xa5   : > { %755 = vmax.xlane.f32.xlu2 %v754_v4 }
  0xa6   : > { %p1055_p6 = pneg %p1054_p5 }
  0xab   : > { %737 = vadd.xlane.f32.xlu1 %v736_v10  ;;  %700 = vadd.xlane.f32.xlu0 %v699_v11 }
 0x116   : > { %v720_v12 = vpop.xlane.xlu1 %719  ;;  %v682_v15 = vpop.xlane.xlu0 %681 }
 0x117   : > { %v721_v16 = vrot.slane %v720_v12, 4  ;;  %v683_v17 = vrot.slane %v682_v15, 4 }
 0x118   : > { %v756_v18 = vpop.xlane.xlu2 %755 }
 0x119   : > { %v757_v19 = vrot.slane %v756_v18, 4  ;;  %v684_v20 = vadd.f32 %v683_v17, %v682_v15  ;;  %v722_v21 = vadd.f32 %v721_v16, %v720_v12 }
 0x11b   : > { %v685_v22 = vrot.slane %v684_v20, 2  ;;  %v758_v24 = vmax.f32 %v756_v18, %v757_v19  ;;  %v723_v26 = vrot.slane %v722_v21, 2 }
 0x11d   : > { %v686_v25 = vadd.f32 %v685_v22, %v684_v20  ;;  %v759_v37 = vrot.slane %v758_v24, 2  ;;  %v724_v42 = vadd.f32 %v723_v26, %v722_v21 }
 0x11e   : > { %v738_v27 = vpop.xlane.xlu1 %737  ;;  %v701_v33 = vpop.xlane.xlu0 %700 }
 0x11f   : > { %v739_v34 = vrot.slane %v738_v27, 4  ;;  %v702_v36 = vrot.slane %v701_v33, 4  ;;  %v687_v38 = vrot.slane %v686_v25, 1  ;;  %v760_v44 = vmax.f32 %v758_v24, %v759_v37 }
 0x120   : > { %v725_v47 = vrot.slane %v724_v42, 1 }
 0x121   : > { %v740_v39 = vadd.f32 %v739_v34, %v738_v27  ;;  %v703_v40 = vadd.f32 %v702_v36, %v701_v33  ;;  %v688_v41 = vadd.f32 %v687_v38, %v686_v25  ;;  %v761_v49 = vrot.slane %v760_v44, 1 }
 0x122   : > { %v726_v35 = vadd.f32 %v725_v47, %v724_v42 }
 0x123   : > { %v741_v30 = vrot.slane %v740_v39, 2  ;;  %v704_v43 = vrot.slane %v703_v40, 2  ;;  %925 = vpush %v688_v41  ;;  %v762_v2 = vmax.f32 %v760_v44, %v761_v49 }
 0x125   : > { %v742_v45 = vadd.f32 %v741_v30, %v740_v39  ;;  %v705_v46 = vadd.f32 %v704_v43, %v703_v40 }
 0x127   : > { %v706_v14 = vrot.slane %v705_v46, 1  ;;  %v743_v48 = vrot.slane %v742_v45, 1 }
 0x129   : > { %v707_v50 = vadd.f32 %v706_v14, %v705_v46  ;;  %v744_v13 = vadd.f32 %v743_v48, %v742_v45 }
 0x12b   : > { %927 = vpush %v707_v50 }
 0x12c   : > { %929 = vpush %v726_v35 }
 0x12d   : > { %931 = vpush %v744_v13 }
 0x12e   : > { %933 = vpush %v762_v2 }
 0x154   : > { %s926_s28 = spop %925 }
 0x155   : > { %v771_v54 = vstv %s926_s28 }
 0x15c   : > { %s928_s29 = spop %927 }
 0x15d   : > { %s930_s6 = spop %929  ;;  %v769_v55 = vstv %s928_s29  ;;  %s1056_s29 = scalar_lea.hbm %s1494_s3, 32 }
 0x15e   : > { %s932_s10 = spop %931  ;;  %v767_v51 = vstv %s930_s6  ;;  %p1058_p9 = scmp.lt.s32.totalorder %s1056_s29, %s1052_s27 }
 0x15f   : > { %v764_v28 = vstv %s932_s10  ;;  %s934_s20 = spop %933 }
 0x160   : > { %v765_v52 = vstv %s934_s20  ;;  %p1059_p10 = por %p1058_p9, %p1057_p7 }
 0x161   : > { %v766_v29 = vsel %vm501_vm3, %v764_v28, %v765_v52 }
 0x162   : > { %v768_v53 = vsel %vm709_vm15, %v767_v51, %v766_v29  ;;  %p1060_p11 = pnand %p1059_p10, %p1055_p6 }
 0x163   : > { %v770_v56 = vsel %vm690_vm0, %v769_v55, %v768_v53 }
 0x164   : > { %v772_v57 = vsel %vm671_vm1, %v771_v54, %v770_v56 }
 0x165   : > { %773 = vst [vmem:[%s288_s11] sm:$0xff] %v772_v57 }
 0x166   : > { %1063 = shalt.err (!%p1060_p11)
}
 0x167   : > { %935 = dma.vmem_to_hbm [thread:$0]  (%p1205_p3), %s790_s15, 128, %s792_s16, %s775_s21  }
 0x168 PF: > { %p941_p12 = scmp.ge.s32.totalorder %s1130_s19, 2  ;;  %s803_s4 = sand.u32 1, %s1102_s12  }
 0x169   : > { %s804_s5 = scalar_lea.sflag [#allocation8], %s803_s4 }
 0x16a   : > { %p938_p13 = pnand %p941_p12, %p1214_p8 }
 0x16c   : > { %p939_p0 = pneg %p938_p13 }
 0x16e   : > { %1097 = dma.done.wait (%p939_p0), %s804_s5, 128  }
 0x16f   : > { %1099 = vsyncadd (%p939_p0), %s804_s5, 4294967168  ;;  %s16_s19 = sadd.s32 1, %s1130_s19   ;;  %s1507_s12 = smov %s1106_s13 }
 0x170   : > { %p13_p1 = scmp.ge.s32.totalorder %s16_s19, 6   ;;  %s1508_s13 = smov %s1110_s14 }
 0x171   : > { %s1509_s14 = smov %s1223_s30  ;;  %s1510_s15 = smov %s1122_s17 }
 0x172   : > { %s1511_s16 = smov %s1126_s18  ;;  %s1512_s17 = smov %s1515_s22 }
 0x173   : > { %s1513_s18 = smov %s1519_s23  ;;  %15 = sbr.rel (!%p13_p1) target bundleno = 5 (0x5), region = 90 }
 0x178   :  { %810 = vsyncpa [#allocation8], 1 }
 0x179   :  { %812 = vsyncpa [#allocation8 + $0x1], 1 }

</bundles_post_ra>
